<compile_context>
chip_gen: v7x
topology: tpu7x:2x2x1
jax: 0.10.0
libtpu: 0.0.40
codegen_flags: <defaults>
</compile_context>

<pallas_src>
import jax
import jax.numpy as jnp
from jax.experimental import pallas as pl
from jax.experimental.pallas import tpu as pltpu  # noqa: F401  (TPU backend)


_INT_MAX = jnp.iinfo(jnp.int32).max


# ----------------------------- kernels -----------------------------

def _offset_masked_kernel(y_ref, x_ref, valid_ref, y_out_ref, x_out_ref):
    y = y_ref[...]              # (B, N) int32
    x = x_ref[...]              # (B, N) int32
    valid = valid_ref[...]      # (B, N) bool, used directly (no != 0 compare)

    # y[valid_mask].min() / x[valid_mask].min(): global min over valid entries.
    # (Two XLU reduces; at these sizes they are noise.  If N ever gets large,
    #  fuse them into one reduction pass to halve XLU work.)
    y_min = jnp.min(jnp.where(valid, y, _INT_MAX))
    x_min = jnp.min(jnp.where(valid, x, _INT_MAX))

    # In-place `y -= ...` / `x -= ...` semantics: subtract the scalar from
    # every position (valid and invalid alike).
    y_out_ref[...] = y - y_min
    x_out_ref[...] = x - x_min


def _offset_unmasked_kernel(y_ref, x_ref, y_out_ref, x_out_ref):
    # valid_mask=None path: y[None].min() reduces over everything.
    y = y_ref[...]
    x = x_ref[...]
    y_out_ref[...] = y - jnp.min(y)
    x_out_ref[...] = x - jnp.min(x)


# ----------------------------- wrapper -----------------------------

def offset_coordinate(p, y, x, valid_mask=None):
    """JAX/Pallas equivalent of OffsetCoordinate.forward.

    p and valid_mask are returned unchanged (pass-through).
    """
    # TODO(synk): torch.LongTensor is int64; TPU path uses int32 (JAX default).
    # Exact int64 parity would need x64 handling outside the kernel.
    out_shape = (
        jax.ShapeDtypeStruct(y.shape, y.dtype),
        jax.ShapeDtypeStruct(x.shape, x.dtype),
    )

    if valid_mask is None:
        y_out, x_out = pl.pallas_call(
            _offset_unmasked_kernel,
            out_shape=out_shape,
            input_output_aliases={0: 0, 1: 1},   # y -> y_out, x -> x_out
        )(y, x)
    else:
        # Keep the mask bool end-to-end (no wrapper astype for bool callers).
        # If the caller holds per-stream `lengths` instead of a mask, a
        # PrefetchScalarGridSpec + in-kernel broadcasted_iota would drop the
        # mask DMA entirely (not needed here).
        mask = valid_mask if valid_mask.dtype == jnp.bool_ else valid_mask.astype(jnp.bool_)
        y_out, x_out = pl.pallas_call(
            _offset_masked_kernel,
            out_shape=out_shape,
            input_output_aliases={0: 0, 1: 1},   # y -> y_out, x -> x_out
        )(y, x, mask)

    return p, y_out, x_out, valid_mask


# ----------------------------- main -----------------------------

if __name__ == "__main__":
    # 8 event streams x 128 events: fills all 8 sublanes of a (8,128) int32
    # vreg and keeps the last dim lane-dense (multiple of 128).
    B, N = 8, 128

    key = jax.random.PRNGKey(0)
    kp, ky, kx = jax.random.split(key, 3)
    p = jax.random.randint(kp, (B, N), 0, 2, dtype=jnp.int32)       # polarity
    y = jax.random.randint(ky, (B, N), 5, 480, dtype=jnp.int32)     # y coords
    x = jax.random.randint(kx, (B, N), 7, 640, dtype=jnp.int32)     # x coords

    # ragged validity: each stream has a different number of valid events
    lengths = jnp.array([[N], [96], [N], [64], [N], [32], [N], [100]],
                        dtype=jnp.int32)
    valid_mask = jnp.arange(N, dtype=jnp.int32)[None, :] < lengths  # (B, N) bool

    # Reference expectations computed BEFORE the (aliased) kernel calls.
    y_min_ref = jnp.min(jnp.where(valid_mask, y, _INT_MAX))
    x_min_ref = jnp.min(jnp.where(valid_mask, x, _INT_MAX))
    y_expect = y - y_min_ref
    x_expect = x - x_min_ref
    y_expect_nomask = y - jnp.min(y)
    x_expect_nomask = x - jnp.min(x)

    # --- masked path ---
    p_out, y_out, x_out, vm_out = offset_coordinate(p, y, x, valid_mask)
    jax.block_until_ready((p_out, y_out, x_out))

    assert y_out.shape == y_expect.shape and x_out.shape == x_expect.shape
    assert bool(jnp.all(p_out == p))
    assert bool(jnp.all(y_out == y_expect))
    assert bool(jnp.all(x_out == x_expect))
    assert int(jnp.min(jnp.where(valid_mask, y_out, _INT_MAX))) == 0
    assert int(jnp.min(jnp.where(valid_mask, x_out, _INT_MAX))) == 0

    # --- mask-free path (valid_mask=None) ---
    _, y2_out, x2_out, _ = offset_coordinate(p, y, x, None)
    jax.block_until_ready((y2_out, x2_out))
    assert bool(jnp.all(y2_out == y_expect_nomask))
    assert bool(jnp.all(x2_out == x_expect_nomask))

    print("KERNEL_OK")
</pallas_src>

<mosaic_0001>
module attributes {stable_mosaic.version = 11 : i64} {
  func.func @_offset_masked_kernel(%arg0: memref<8x128xi32, #tpu.memory_space<vmem>>, %arg1: memref<8x128xi32, #tpu.memory_space<vmem>>, %arg2: memref<8x128xi32, #tpu.memory_space<vmem>>, %arg3: memref<8x128xi32, #tpu.memory_space<vmem>>, %arg4: memref<8x128xi32, #tpu.memory_space<vmem>>) attributes {dimension_semantics = [], scalar_prefetch = 0 : i64, scratch_operands = 0 : i64, tpu.core_type = #tpu.core_type<tc>} {
    %c0 = arith.constant 0 : index
    %c0_0 = arith.constant 0 : index
    %0 = vector.load %arg0[%c0, %c0_0] : memref<8x128xi32, #tpu.memory_space<vmem>>, vector<8x128xi32>
    %c0_1 = arith.constant 0 : index
    %c0_2 = arith.constant 0 : index
    %1 = vector.load %arg1[%c0_1, %c0_2] : memref<8x128xi32, #tpu.memory_space<vmem>>, vector<8x128xi32>
    %c0_3 = arith.constant 0 : index
    %c0_4 = arith.constant 0 : index
    %2 = vector.load %arg2[%c0_3, %c0_4] : memref<8x128xi32, #tpu.memory_space<vmem>>, vector<8x128xi32>
    %cst = arith.constant dense<0> : vector<8x128xi32>
    %3 = arith.cmpi ne, %2, %cst : vector<8x128xi32>
    %c2147483647_i32 = arith.constant 2147483647 : i32
    %4 = vector.broadcast %c2147483647_i32 : i32 to vector<8x128xi32>
    %5 = arith.select %3, %0, %4 : vector<8x128xi1>, vector<8x128xi32>
    %6 = vector.shape_cast %5 : vector<8x128xi32> to vector<1x8x128xi32>
    %cst_5 = arith.constant dense<2147483647> : vector<1xi32>
    %7 = vector.multi_reduction <minsi>, %6, %cst_5 [1, 2] : vector<1x8x128xi32> to vector<1xi32>
    %8 = vector.shape_cast %7 : vector<1xi32> to vector<1x1x1xi32>
    %9 = vector.extract %8[0, 0, 0] : i32 from vector<1x1x1xi32>
    %c2147483647_i32_6 = arith.constant 2147483647 : i32
    %10 = vector.broadcast %c2147483647_i32_6 : i32 to vector<8x128xi32>
    %11 = arith.select %3, %1, %10 : vector<8x128xi1>, vector<8x128xi32>
    %12 = vector.shape_cast %11 : vector<8x128xi32> to vector<1x8x128xi32>
    %cst_7 = arith.constant dense<2147483647> : vector<1xi32>
    %13 = vector.multi_reduction <minsi>, %12, %cst_7 [1, 2] : vector<1x8x128xi32> to vector<1xi32>
    %14 = vector.shape_cast %13 : vector<1xi32> to vector<1x1x1xi32>
    %15 = vector.extract %14[0, 0, 0] : i32 from vector<1x1x1xi32>
    %16 = vector.broadcast %9 : i32 to vector<8x128xi32>
    %17 = arith.subi %0, %16 : vector<8x128xi32>
    %c0_8 = arith.constant 0 : index
    %c0_9 = arith.constant 0 : index
    %18 = vector.load %arg3[%c0_8, %c0_9] : memref<8x128xi32, #tpu.memory_space<vmem>>, vector<8x128xi32>
    tpu.vector_store %arg3[%c0_8, %c0_9], %17 {strides = array<i32>} : memref<8x128xi32, #tpu.memory_space<vmem>>, vector<8x128xi32>,
    %19 = vector.broadcast %15 : i32 to vector<8x128xi32>
    %20 = arith.subi %1, %19 : vector<8x128xi32>
    %c0_10 = arith.constant 0 : index
    %c0_11 = arith.constant 0 : index
    %21 = vector.load %arg4[%c0_10, %c0_11] : memref<8x128xi32, #tpu.memory_space<vmem>>, vector<8x128xi32>
    tpu.vector_store %arg4[%c0_10, %c0_11], %20 {strides = array<i32>} : memref<8x128xi32, #tpu.memory_space<vmem>>, vector<8x128xi32>,
    return
  }
}

</mosaic_0001>

<bundles_post_ra>
// kernel: tpu_custom_call.1
= control target key start
LH: loop header
LB: loop body
LE: loop exit
PB: predicated region body
PF: predicated region fallthrough
CT: control target
= control target key end

     0   :  { %10 = vsyncpa [#allocation3], 0  ;;  %s320_s0 = inlined_call_operand.hbm [shape: s32[8,128], index: 0, kind: input, shape index: {}, may-alias: {0,3}]   ;;  %s321_s1 = inlined_call_operand.hbm [shape: s32[8,128], index: 1, kind: input, shape index: {}, may-alias: {1,4}]   ;;  %s322_s2 = inlined_call_operand.vmem [shape: s32[8,128], index: 2, kind: input, shape index: {}]   ;;  %s323_s3 = inlined_call_operand.hbm [shape: s32[8,128], index: 3, kind: output, shape index: {0}, may-alias: {0,3}]   ;;  %s324_s4 = inlined_call_operand.hbm [shape: s32[8,128], index: 4, kind: output, shape index: {1}, may-alias: {1,4}]  }
   0x1   :  { %11 = vsyncpa [#allocation6], 0 }
   0x2   :  { %12 = vsyncpa [#allocation4], 0 }
   0x3   :  { %13 = vsyncpa [#allocation9], 0  ;;  %s236_s15 = smov [#allocation2]   ;;  %s237_s17 = smov [#allocation5]  }
   0x4   :  { %s20_s16 = sshll.u32 %s236_s15, 4  ;;  %s30_s18 = sshll.u32 %s237_s17, 4  ;;  %s21_s16 = int_to_ptr.vmem [resolvable:$true] %s20_s16  ;;  %s31_s18 = int_to_ptr.vmem [resolvable:$true] %s30_s18 }
   0x5   :  { %s140_s21 = scalar_lea.hbm %s320_s0, 128 }
   0x6   :  { %p141_p0 = scmp.ne.s32.totalorder %s320_s0, %s140_s21  ;;  %p144_p1 = scmp.lt.u32.totalorder %s140_s21, %s320_s0 }
   0x8   :  { %p146_p2 = pnand %p144_p1, %p141_p0 }
   0xa   :  { %149 = shalt.err (!%p146_p2)
}
   0xb   :  { %s150_s26 = scalar_lea.vmem %s21_s16, 128  ;;  %p155_p4 = scmp.lt.s32.totalorder %s21_s16, %s21_s16 }
   0xc   :  { %p151_p3 = scmp.ne.s32.totalorder %s21_s16, %s150_s26  ;;  %p156_p5 = scmp.lt.s32.totalorder %s150_s26, %s150_s26 }
   0xe   :  { %p157_p6 = por %p156_p5, %p155_p4 }
  0x10   :  { %p158_p7 = pnand %p157_p6, %p151_p3 }
  0x12   :  { %161 = shalt.err (!%p158_p7)
}
  0x13   :  { %23 = dma.hbm_to_vmem [thread:$0]  %s320_s0, 128, %s21_s16, [#allocation3]  }
  0x14   :  { %s162_s5 = scalar_lea.hbm %s321_s1, 128 }
  0x15   :  { %p163_p8 = scmp.ne.s32.totalorder %s321_s1, %s162_s5  ;;  %p166_p9 = scmp.lt.u32.totalorder %s162_s5, %s321_s1 }
  0x17   :  { %p168_p10 = pnand %p166_p9, %p163_p8 }
  0x19   :  { %171 = shalt.err (!%p168_p10)
}
  0x1a   :  { %s172_s10 = scalar_lea.vmem %s31_s18, 128  ;;  %p177_p12 = scmp.lt.s32.totalorder %s31_s18, %s31_s18 }
  0x1b   :  { %p173_p11 = scmp.ne.s32.totalorder %s31_s18, %s172_s10  ;;  %p178_p13 = scmp.lt.s32.totalorder %s172_s10, %s172_s10 }
  0x1d   :  { %p179_p0 = por %p178_p13, %p177_p12 }
  0x1f   :  { %p180_p1 = pnand %p179_p0, %p173_p11 }
  0x21   :  { %183 = shalt.err (!%p180_p1)
}
  0x22   :  { %33 = dma.hbm_to_vmem [thread:$0]  %s321_s1, 128, %s31_s18, [#allocation6]  }
  0x23   :  { %228 = dma.done.wait [#allocation3], 128  }
  0x24   :  { %229 = vsyncadd [#allocation3], 4294967168 }
  0x25   :  { %230 = dma.done.wait [#allocation6], 128  }
  0x26   :  { %231 = vsyncadd [#allocation6], 4294967168  ;;  %v42_v0 = vld [vmem:[#allocation2] sm:$0xff]  ;;  %v292_v2 = vld [vmem:[#allocation5] sm:$0xff]  ;;  %s238_s1 = smov [#allocation7]   ;;  %s239_s15 = smov [#allocation8]  }
  0x27   :  { %v44_v1 = vld [vmem:[%s322_s2] sm:$0xff]  ;;  %s108_s2 = sshll.u32 %s238_s1, 4  ;;  %s118_s16 = sshll.u32 %s239_s15, 4  ;;  %s109_s2 = int_to_ptr.vmem [resolvable:$true] %s108_s2  ;;  %s119_s16 = int_to_ptr.vmem [resolvable:$true] %s118_s16 }
  0x28   :  { %vm45_vm0 = vcmp.ne.s32.totalorder %v44_v1, 0  ;;  %s184_s18 = scalar_lea.vmem %s109_s2, 128  ;;  %p189_p3 = scmp.lt.s32.totalorder %s109_s2, %s109_s2 }
  0x29   :  { %v46_v3 = vsel %vm45_vm0, %v42_v0, 2147483647  ;;  %v71_v4 = vsel %vm45_vm0, %v292_v2, 2147483647  ;;  %p185_p2 = scmp.ne.s32.totalorder %s109_s2, %s184_s18  ;;  %p190_p4 = scmp.lt.s32.totalorder %s184_s18, %s184_s18 }
  0x2a   :  { %v48_v5 = vshra.s32 %v46_v3, 16  ;;  %v73_v6 = vshra.s32 %v71_v4, 16  ;;  %v47_v9 = vand.u32 65535, %v46_v3  ;;  %v72_v11 = vand.u32 65535, %v71_v4 }
  0x2b   :  { %p191_p5 = por %p190_p4, %p189_p3 }
  0x2c   :  { %v50_v7 = vcvt.s32.f32 %v48_v5  ;;  %v75_v8 = vcvt.s32.f32 %v73_v6  ;;  %v49_v10 = vcvt.s32.f32 %v47_v9  ;;  %v74_v14 = vcvt.s32.f32 %v72_v11 }
  0x2d   :  { %p192_p6 = pnand %p191_p5, %p185_p2 }
  0x2e   :  { %51 = vmin.xlane.f32.xlu0 %v50_v7 }
  0x32   :  { %76 = vmin.xlane.f32.xlu0 %v75_v8 }
  0xbb   :  { %v52_v12 = vpop.xlane.xlu0 %51 }
  0xbc   :  { %vm53_vm1 = vcmp.eq.f32.partialorder %v50_v7, %v52_v12  ;;  %v58_v17 = vcvt.f32.s32 %v52_v12 }
  0xbd   :  { %v54_v13 = vsel %vm53_vm1, %v49_v10, inf }
  0xbe   :  { %55 = vmin.xlane.f32.xlu1 %v54_v13  ;;  %v59_v19 = vshll.u32 %v58_v17, 16 }
  0xbf   :  { %v77_v15 = vpop.xlane.xlu0 %76 }
  0xc0   :  { %vm78_vm2 = vcmp.eq.f32.partialorder %v75_v8, %v77_v15  ;;  %v83_v20 = vcvt.f32.s32 %v77_v15 }
  0xc1   :  { %v79_v16 = vsel %vm78_vm2, %v74_v14, inf }
  0xc2   :  { %80 = vmin.xlane.f32.xlu1 %v79_v16  ;;  %v84_v24 = vshll.u32 %v83_v20, 16 }
 0x14b   :  { %v56_v18 = vpop.xlane.xlu1 %55 }
 0x14c   :  { %v57_v21 = vcvt.f32.s32 %v56_v18 }
 0x14e   :  { %v60_v22 = vadd.s32 %v59_v19, %v57_v21 }
 0x14f   :  { %v81_v23 = vpop.xlane.xlu1 %80 }
 0x150   :  { %v61_v25 = vrot.slane %v60_v22, 4  ;;  %v82_v26 = vcvt.f32.s32 %v81_v23 }
 0x152   :  { %v85_v27 = vadd.s32 %v84_v24, %v82_v26  ;;  %vm62_vm3 = vcmp.lt.s32.totalorder %v60_v22, %v61_v25 }
 0x153   :  { %v63_v28 = vsel %vm62_vm3, %v60_v22, %v61_v25 }
 0x154   :  { %v86_v29 = vrot.slane %v85_v27, 4  ;;  %v64_v30 = vrot.slane %v63_v28, 2 }
 0x156   :  { %vm87_vm4 = vcmp.lt.s32.totalorder %v85_v27, %v86_v29  ;;  %vm65_vm5 = vcmp.lt.s32.totalorder %v63_v28, %v64_v30 }
 0x157   :  { %v66_v31 = vsel %vm65_vm5, %v63_v28, %v64_v30  ;;  %v88_v32 = vsel %vm87_vm4, %v85_v27, %v86_v29 }
 0x158   :  { %v67_v33 = vrot.slane %v66_v31, 1  ;;  %v89_v34 = vrot.slane %v88_v32, 2 }
 0x15a   :  { %vm68_vm6 = vcmp.lt.s32.totalorder %v66_v31, %v67_v33  ;;  %vm90_vm7 = vcmp.lt.s32.totalorder %v88_v32, %v89_v34 }
 0x15b   :  { %v69_v35 = vsel %vm68_vm6, %v66_v31, %v67_v33  ;;  %v91_v36 = vsel %vm90_vm7, %v88_v32, %v89_v34 }
 0x15c   :  { %132 = vpush %v69_v35  ;;  %v92_v37 = vrot.slane %v91_v36, 1 }
 0x15e   :  { %vm93_vm8 = vcmp.lt.s32.totalorder %v91_v36, %v92_v37 }
 0x15f   :  { %v94_v38 = vsel %vm93_vm8, %v91_v36, %v92_v37 }
 0x160   :  { %134 = vpush %v94_v38 }
 0x18d   :  { %s133_s14 = spop %132 }
 0x18e   :  { %v96_v39 = vstv %s133_s14 }
 0x18f   :  { %v97_v40 = vsub.s32 %v42_v0, %v96_v39 }
 0x191   :  { %98 = vst [vmem:[#allocation7] sm:$0xff] %v97_v40  ;;  %s135_s17 = spop %134 }
 0x192   :  { %v99_v41 = vstv %s135_s17 }
 0x193   :  { %195 = shalt.err (!%p192_p6)
}
 0x194   :  { %s196_s21 = scalar_lea.hbm %s323_s3, 128 }
 0x195   :  { %p197_p7 = scmp.ne.s32.totalorder %s323_s3, %s196_s21  ;;  %p200_p8 = scmp.lt.u32.totalorder %s196_s21, %s323_s3 }
 0x197   :  { %p202_p9 = pnand %p200_p8, %p197_p7 }
 0x199   :  { %205 = shalt.err (!%p202_p9)
}
 0x19a   :  { %111 = dma.vmem_to_hbm [thread:$0]  %s109_s2, 128, %s323_s3, [#allocation4]   ;;  %v100_v42 = vsub.s32 %v292_v2, %v99_v41 }
 0x19b   :  { %s206_s28 = scalar_lea.vmem %s119_s16, 128  ;;  %p211_p11 = scmp.lt.s32.totalorder %s119_s16, %s119_s16 }
 0x19c   :  { %101 = vst [vmem:[#allocation8] sm:$0xff] %v100_v42  ;;  %p207_p10 = scmp.ne.s32.totalorder %s119_s16, %s206_s28  ;;  %p212_p12 = scmp.lt.s32.totalorder %s206_s28, %s206_s28 }
 0x19e   :  { %p213_p13 = por %p212_p12, %p211_p11 }
 0x1a0   :  { %p214_p0 = pnand %p213_p13, %p207_p10 }
 0x1a2   :  { %217 = shalt.err (!%p214_p0)
}
 0x1a3   :  { %s218_s5 = scalar_lea.hbm %s324_s4, 128 }
 0x1a4   :  { %p219_p1 = scmp.ne.s32.totalorder %s324_s4, %s218_s5  ;;  %p222_p2 = scmp.lt.u32.totalorder %s218_s5, %s324_s4 }
 0x1a6   :  { %p224_p3 = pnand %p222_p2, %p219_p1 }
 0x1a8   :  { %227 = shalt.err (!%p224_p3)
}
 0x1a9   :  { %121 = dma.vmem_to_hbm [thread:$0]  %s119_s16, 128, %s324_s4, [#allocation9]  }
 0x1aa   :  { %232 = dma.done.wait [#allocation4], 128  }
 0x1ab   :  { %233 = vsyncadd [#allocation4], 4294967168 }
 0x1ac   :  { %234 = dma.done.wait [#allocation9], 128  }
 0x1ad   :  { %235 = vsyncadd [#allocation9], 4294967168 }
 0x1ae   :  { %128 = vsyncpa [#allocation3], 1 }
 0x1af   :  { %129 = vsyncpa [#allocation6], 1 }
 0x1b0   :  { %130 = vsyncpa [#allocation4], 1 }
 0x1b1   :  { %131 = vsyncpa [#allocation9], 1 }

</bundles_post_ra>
